<compile_context>
chip_gen: v7x
topology: tpu7x:2x2x1
jax: 0.10.0
libtpu: 0.0.40
codegen_flags: <defaults>
</compile_context>

<pallas_src>
import functools

import jax
import jax.numpy as jnp
from jax.experimental import pallas as pl
from jax.experimental.pallas import tpu as pltpu

LANE = 128
_MIB = 1024 * 1024


def _round_up(x, m):
    return ((x + m - 1) // m) * m


def _pick_tile(n, target):
    """Largest multiple of 128 that divides n and is <= min(target, n)."""
    t = min(target, n)
    t = (t // LANE) * LANE
    while t > LANE and n % t != 0:
        t -= LANE
    return max(t, LANE)


# ----------------------------------------------------------------------------
# Kernel 1: dense feature transform   XW = H @ W + b   (computed once per layer)
# Grid = (num_row_tiles,).  W and b are resident; H streams tile-by-tile.
# Output emitted in bf16 so the aggregation kernel gets MXU-ready operands.
# ----------------------------------------------------------------------------
def _feature_transform_kernel(h_ref, w_ref, b_ref, out_ref):
    xw = jnp.dot(h_ref[...], w_ref[...], preferred_element_type=jnp.float32)
    out_ref[...] = (xw + b_ref[...]).astype(out_ref.dtype)


def _feature_transform(h, w, b, *, tile_target=512):
    """h: [Np, Fin_p] bf16, w: [Fin_p, Fout_p] bf16, b: [1, Fout_p] f32
    returns XW: [Np, Fout_p] bf16."""
    n_p, fin_p = h.shape
    fout_p = w.shape[1]
    tm = _pick_tile(n_p, tile_target)
    assert n_p % tm == 0
    grid = (n_p // tm,)

    cost = pl.CostEstimate(
        flops=2 * n_p * fin_p * fout_p,
        transcendentals=0,
        bytes_accessed=(h.size * h.dtype.itemsize
                        + w.size * w.dtype.itemsize
                        + b.size * b.dtype.itemsize
                        + n_p * fout_p * 2),
    )

    return pl.pallas_call(
        _feature_transform_kernel,
        out_shape=jax.ShapeDtypeStruct((n_p, fout_p), jnp.bfloat16),
        grid_spec=pltpu.PrefetchScalarGridSpec(
            num_scalar_prefetch=0,
            grid=grid,
            in_specs=[
                pl.BlockSpec((tm, fin_p), lambda i: (i, 0)),        # H row tile
                pl.BlockSpec((fin_p, fout_p), lambda i: (0, 0)),    # W (resident)
                pl.BlockSpec((1, fout_p), lambda i: (0, 0)),        # bias (resident)
            ],
            out_specs=pl.BlockSpec((tm, fout_p), lambda i: (i, 0)),
        ),
        compiler_params=pltpu.CompilerParams(
            dimension_semantics=("parallel",),
        ),
        cost_estimate=cost,
    )(h, w, b)


# ----------------------------------------------------------------------------
# Kernel 2: neighborhood aggregation   out[i, :] = sum_k A[i, k] @ XW[k, :]
# Grid = (num_row_tiles, num_k_tiles); k is the reduction axis (last), the
# output block is resident across it (accumulator pattern).  Only A streams.
# ----------------------------------------------------------------------------
def _aggregate_kernel(a_ref, xw_ref, out_ref, acc_ref, *,
                      apply_relu, tk, xw_resident):
    k = pl.program_id(1)

    @pl.when(k == 0)
    def _init():
        acc_ref[...] = jnp.zeros_like(acc_ref)

    if xw_resident:
        # XW is fully VMEM-resident (constant-index BlockSpec); slice the
        # k-tile of source nodes out of it here.
        start = pl.multiple_of(k * tk, LANE)
        xw_tile = xw_ref[pl.ds(start, tk), :]
    else:
        xw_tile = xw_ref[...]

    acc_ref[...] += jnp.dot(a_ref[...], xw_tile,
                            preferred_element_type=jnp.float32)

    @pl.when(k == pl.num_programs(1) - 1)
    def _finalize():
        r = acc_ref[...]
        if apply_relu:
            r = jnp.maximum(r, 0.0)
        out_ref[...] = r.astype(out_ref.dtype)


def _aggregate(a, xw, *, apply_relu, out_dtype, tile_target=512):
    """a: [Np, Np] bf16, xw: [Np, Fout_p] bf16  ->  [Np, Fout_p] out_dtype."""
    n_p = a.shape[0]
    fout_p = xw.shape[1]

    tm = _pick_tile(n_p, tile_target)
    # Keep at least 2 row tiles where possible so the "parallel" axis can split
    # across the two v7x TensorCores.
    if n_p >= 2 * LANE and n_p // tm < 2:
        tm = _pick_tile(n_p, n_p // 2)
    tk = _pick_tile(n_p, tile_target)
    assert n_p % tm == 0 and n_p % tk == 0
    grid = (n_p // tm, n_p // tk)

    out_itemsize = jnp.dtype(out_dtype).itemsize

    # Conservative VMEM estimate (assume double-buffering on every operand).
    resident_bytes = (2 * tm * tk * 2            # A tiles (bf16)
                      + 2 * n_p * fout_p * 2     # resident XW (bf16)
                      + 2 * tm * fout_p * out_itemsize
                      + tm * fout_p * 4)         # f32 accumulator scratch
    xw_resident = resident_bytes <= 32 * _MIB

    if xw_resident:
        xw_spec = pl.BlockSpec((n_p, fout_p), lambda i, k: (0, 0))
        xw_hbm_reads = 1
        vmem_bytes = resident_bytes
    else:
        # Fallback for very large graphs / tight scoped VMEM (e.g. v5e default):
        # stream XW k-tile by k-tile (re-read once per row tile).
        xw_spec = pl.BlockSpec((tk, fout_p), lambda i, k: (k, 0))
        xw_hbm_reads = grid[0]
        vmem_bytes = (2 * tm * tk * 2 + 2 * tk * fout_p * 2
                      + 2 * tm * fout_p * out_itemsize + tm * fout_p * 4)

    compiler_kwargs = dict(dimension_semantics=("parallel", "arbitrary"))
    if vmem_bytes > 16 * _MIB:
        # Raise the scoped-VMEM limit deliberately, with headroom, but stay
        # well inside v7x's 64 MiB physical VMEM.
        compiler_kwargs["vmem_limit_bytes"] = min(vmem_bytes + 8 * _MIB,
                                                  48 * _MIB)

    cost = pl.CostEstimate(
        flops=2 * n_p * n_p * fout_p,
        transcendentals=0,
        bytes_accessed=(a.size * a.dtype.itemsize
                        + xw_hbm_reads * xw.size * xw.dtype.itemsize
                        + n_p * fout_p * out_itemsize),
    )

    return pl.pallas_call(
        functools.partial(_aggregate_kernel, apply_relu=apply_relu,
                          tk=tk, xw_resident=xw_resident),
        out_shape=jax.ShapeDtypeStruct((n_p, fout_p), out_dtype),
        grid_spec=pltpu.PrefetchScalarGridSpec(
            num_scalar_prefetch=0,
            grid=grid,
            in_specs=[
                pl.BlockSpec((tm, tk), lambda i, k: (i, k)),   # A row/col tile
                xw_spec,                                       # XW (resident or k-streamed)
            ],
            out_specs=pl.BlockSpec((tm, fout_p), lambda i, k: (i, 0)),
            scratch_shapes=[pltpu.VMEM((tm, fout_p), jnp.float32)],
        ),
        compiler_params=pltpu.CompilerParams(**compiler_kwargs),
        cost_estimate=cost,
    )(a, xw)


# ----------------------------------------------------------------------------
# Wrapper: two-layer GCN forward matching the PyTorch module (f32 in/out).
# ----------------------------------------------------------------------------
def gcn_forward(H, A_norm, W1, b1, W2, b2, *, tile_target=512):
    N, F_in = H.shape
    F_h = W1.shape[1]
    C = W2.shape[1]

    n_p = _round_up(N, LANE)
    fin_p = _round_up(F_in, LANE)
    fh_p = _round_up(F_h, LANE)
    c_p = _round_up(C, LANE)

    def pad2(x, rows, cols, dtype):
        x = x.astype(dtype)
        return jnp.pad(x, ((0, rows - x.shape[0]), (0, cols - x.shape[1])))

    # Zero padding is exact: padded A rows/cols are 0, padded W/b cols are 0,
    # so padded contributions (incl. the bias picked up by padded nodes) vanish.
    A_p = pad2(A_norm, n_p, n_p, jnp.bfloat16)
    H_p = pad2(H, n_p, fin_p, jnp.bfloat16)
    W1_p = pad2(W1, fin_p, fh_p, jnp.bfloat16)
    b1_p = pad2(b1.reshape(1, -1), 1, fh_p, jnp.float32)
    W2_p = pad2(W2, fh_p, c_p, jnp.bfloat16)
    b2_p = pad2(b2.reshape(1, -1), 1, c_p, jnp.float32)

    # Layer 1: ReLU( A @ (H @ W1 + b1) ) — hidden activations emitted as bf16.
    xw1 = _feature_transform(H_p, W1_p, b1_p, tile_target=tile_target)
    h1 = _aggregate(A_p, xw1, apply_relu=True, out_dtype=jnp.bfloat16,
                    tile_target=tile_target)

    # Layer 2: A @ (h1 @ W2 + b2) — final logits in f32.
    xw2 = _feature_transform(h1, W2_p, b2_p, tile_target=tile_target)
    logits_p = _aggregate(A_p, xw2, apply_relu=False, out_dtype=jnp.float32,
                          tile_target=tile_target)

    return logits_p[:N, :C]


# ----------------------------------------------------------------------------
# References for the correctness check.
# ----------------------------------------------------------------------------
def reference_forward_f32(H, A_norm, W1, b1, W2, b2):
    h1 = jnp.maximum(A_norm @ (H @ W1 + b1), 0.0)
    return A_norm @ (h1 @ W2 + b2)


def reference_forward_matched(H, A_norm, W1, b1, W2, b2):
    """Same bf16-operand / f32-accumulate precision policy as the kernels."""
    Ab = A_norm.astype(jnp.bfloat16)
    xw1 = jnp.dot(H.astype(jnp.bfloat16), W1.astype(jnp.bfloat16),
                  preferred_element_type=jnp.float32) + b1
    h1 = jnp.maximum(
        jnp.dot(Ab, xw1.astype(jnp.bfloat16), preferred_element_type=jnp.float32), 0.0)
    xw2 = jnp.dot(h1.astype(jnp.bfloat16), W2.astype(jnp.bfloat16),
                  preferred_element_type=jnp.float32) + b2
    return jnp.dot(Ab, xw2.astype(jnp.bfloat16), preferred_element_type=jnp.float32)


if __name__ == "__main__":
    # Small, deterministic problem: N nodes, in_features -> hidden -> classes.
    N, F_IN, F_H, C = 64, 32, 64, 8

    key = jax.random.PRNGKey(0)
    k_h, k_adj, k_w1, k_b1, k_w2, k_b2 = jax.random.split(key, 6)

    # Node features.
    H = jax.random.normal(k_h, (N, F_IN), dtype=jnp.float32)

    # Deterministic symmetric-normalized adjacency: D^-1/2 (A + I) D^-1/2.
    A_rand = (jax.random.uniform(k_adj, (N, N)) < 0.1).astype(jnp.float32)
    A = jnp.maximum(A_rand, A_rand.T)                 # symmetrize
    A = A + jnp.eye(N, dtype=jnp.float32)             # self loops
    deg = jnp.sum(A, axis=1)
    d_inv_sqrt = 1.0 / jnp.sqrt(deg)
    A_norm = A * d_inv_sqrt[:, None] * d_inv_sqrt[None, :]

    # Deterministic parameter init (synthetic; shapes from GCN.__init__).
    W1 = jax.random.normal(k_w1, (F_IN, F_H), dtype=jnp.float32) * 0.1
    b1 = jax.random.normal(k_b1, (1, F_H), dtype=jnp.float32) * 0.01
    W2 = jax.random.normal(k_w2, (F_H, C), dtype=jnp.float32) * 0.1
    b2 = jax.random.normal(k_b2, (1, C), dtype=jnp.float32) * 0.01

    logits = gcn_forward(H, A_norm, W1, b1, W2, b2)
    jax.block_until_ready(logits)
    assert logits.shape == (N, C)

    # Tight check against a precision-matched (bf16 operand, f32 accum) reference.
    ref_matched = reference_forward_matched(H, A_norm, W1, b1, W2, b2)
    assert jnp.allclose(logits, ref_matched, atol=2e-3, rtol=2e-3), (
        float(jnp.max(jnp.abs(logits - ref_matched))))

    # Loose check against the full-f32 reference (bf16 operand rounding only).
    ref_f32 = reference_forward_f32(H, A_norm, W1, b1, W2, b2)
    assert jnp.allclose(logits, ref_f32, atol=3e-2, rtol=3e-2), (
        float(jnp.max(jnp.abs(logits - ref_f32))))

    print("KERNEL_OK")
</pallas_src>

<mosaic_0001>
module attributes {stable_mosaic.version = 11 : i64} {
  func.func @_feature_transform_kernel(%arg0: i32, %arg1: memref<128x128xbf16, #tpu.memory_space<vmem>>, %arg2: memref<128x128xbf16, #tpu.memory_space<vmem>>, %arg3: memref<1x128xf32, #tpu.memory_space<vmem>>, %arg4: memref<128x128xbf16, #tpu.memory_space<vmem>>) attributes {dimension_semantics = [#tpu.dimension_semantics<parallel>], iteration_bounds = array<i64: 1>, scalar_prefetch = 0 : i64, scratch_operands = 0 : i64, tpu.core_type = #tpu.core_type<tc>, window_params = [{transform_indices = @transform_0, window_bounds = array<i64: 128, 128>}, {pipeline_mode = #tpu.pipeline_mode<synchronous>, transform_indices = @transform_1, window_bounds = array<i64: 128, 128>}, {pipeline_mode = #tpu.pipeline_mode<synchronous>, transform_indices = @transform_2, window_bounds = array<i64: 1, 128>}, {transform_indices = @transform_3, window_bounds = array<i64: 128, 128>}]} {
    %c0 = arith.constant 0 : index
    %c0_0 = arith.constant 0 : index
    %0 = vector.load %arg1[%c0, %c0_0] : memref<128x128xbf16, #tpu.memory_space<vmem>>, vector<128x128xbf16>
    %c0_1 = arith.constant 0 : index
    %c0_2 = arith.constant 0 : index
    %1 = vector.load %arg2[%c0_1, %c0_2] : memref<128x128xbf16, #tpu.memory_space<vmem>>, vector<128x128xbf16>
    %cst = arith.constant dense<0.000000e+00> : vector<128x128xf32>
    %2 = tpu.matmul %0, %1, %cst {dimension_numbers = #tpu.dot_dimension_numbers<[1], [0], [0], [1], [0, 0, 1, 1], [], []>} : vector<128x128xbf16>, vector<128x128xbf16>, vector<128x128xf32> -> vector<128x128xf32>
    %c0_3 = arith.constant 0 : index
    %c0_4 = arith.constant 0 : index
    %3 = vector.load %arg3[%c0_3, %c0_4] : memref<1x128xf32, #tpu.memory_space<vmem>>, vector<1x128xf32>
    %4 = vector.broadcast %3 : vector<1x128xf32> to vector<128x128xf32>
    %5 = arith.addf %2, %4 : vector<128x128xf32>
    %6 = arith.truncf %5 : vector<128x128xf32> to vector<128x128xbf16>
    %c0_5 = arith.constant 0 : index
    %c0_6 = arith.constant 0 : index
    %7 = vector.load %arg4[%c0_5, %c0_6] : memref<128x128xbf16, #tpu.memory_space<vmem>>, vector<128x128xbf16>
    tpu.vector_store %arg4[%c0_5, %c0_6], %6 {strides = array<i32>} : memref<128x128xbf16, #tpu.memory_space<vmem>>, vector<128x128xbf16>,
    return
  }
  func.func @transform_0(%arg0: i32) -> (i32, i32) {
    %c0_i32 = arith.constant 0 : i32
    %c0_i32_0 = arith.constant 0 : i32
    return %arg0, %c0_i32 : i32, i32
  }
  func.func @transform_1(%arg0: i32) -> (i32, i32) {
    %c0_i32 = arith.constant 0 : i32
    %c0_i32_0 = arith.constant 0 : i32
    %c0_i32_1 = arith.constant 0 : i32
    return %c0_i32, %c0_i32_0 : i32, i32
  }
  func.func @transform_2(%arg0: i32) -> (i32, i32) {
    %c0_i32 = arith.constant 0 : i32
    %c0_i32_0 = arith.constant 0 : i32
    %c0_i32_1 = arith.constant 0 : i32
    return %c0_i32, %c0_i32_0 : i32, i32
  }
  func.func @transform_3(%arg0: i32) -> (i32, i32) {
    %c0_i32 = arith.constant 0 : i32
    %c0_i32_0 = arith.constant 0 : i32
    return %arg0, %c0_i32 : i32, i32
  }
}

</mosaic_0001>

<bundles_post_ra>
// kernel: tpu_custom_call.1
= control target key start
LH: loop header
LB: loop body
LE: loop exit
PB: predicated region body
PF: predicated region fallthrough
CT: control target
= control target key end

     0   :  { %8 = vsyncpa [#allocation3], 0  ;;  %s700_s0 = inlined_call_operand.hbm [shape: bf16[128,128], index: 0, kind: input, shape index: {}]   ;;  %s701_s1 = inlined_call_operand.hbm [shape: bf16[128,128], index: 1, kind: input, shape index: {}]   ;;  %s702_s2 = inlined_call_operand.vmem [shape: f32[1,128], index: 2, kind: input, shape index: {}]   ;;  %s703_s3 = inlined_call_operand.hbm [shape: bf16[128,128], index: 3, kind: output, shape index: {}]  }
   0x1   :  { %9 = vsyncpa [#allocation6], 0 }
   0x2   :  { %10 = vsyncpa [#allocation4], 0  ;;  %s627_s12 = smov [#allocation2]   ;;  %s555_s16 = scalar_lea.hbm %s700_s0, 1024 }
   0x3   :  { %s16_s13 = sshll.u32 %s627_s12, 4  ;;  %p556_p0 = scmp.ne.s32.totalorder %s700_s0, %s555_s16  ;;  %s17_s13 = int_to_ptr.vmem [resolvable:$true] %s16_s13 }
   0x4   :  { %p559_p1 = scmp.lt.u32.totalorder %s555_s16, %s700_s0 }
   0x6   :  { %p561_p2 = pnand %p559_p1, %p556_p0 }
   0x8   :  { %564 = shalt.err (!%p561_p2)
}
   0x9   :  { %s565_s21 = scalar_lea.vmem %s17_s13, 1024  ;;  %p570_p4 = scmp.lt.s32.totalorder %s17_s13, %s17_s13 }
   0xa   :  { %p566_p3 = scmp.ne.s32.totalorder %s17_s13, %s565_s21  ;;  %p571_p5 = scmp.lt.s32.totalorder %s565_s21, %s565_s21 }
   0xc   :  { %p572_p6 = por %p571_p5, %p570_p4 }
   0xe   :  { %p573_p7 = pnand %p572_p6, %p566_p3 }
  0x10   :  { %576 = shalt.err (!%p573_p7)
}
  0x11   :  { %s628_s22 = smov 64   ;;  %s629_s23 = smov 4  }
  0x12   :  { %22 = dma.hbm_to_vmem [thread:$0]  %s700_s0, 1024, %s17_s13, [#allocation3], %s628_s22, %s628_s22, %s629_s23  }
  0x13   :  { %s630_s26 = smov [#allocation5]   ;;  %s577_s30 = scalar_lea.hbm %s701_s1, 1024 }
  0x14   :  { %s28_s27 = sshll.u32 %s630_s26, 4  ;;  %p578_p8 = scmp.ne.s32.totalorder %s701_s1, %s577_s30  ;;  %s29_s27 = int_to_ptr.vmem [resolvable:$true] %s28_s27 }
  0x15   :  { %p581_p9 = scmp.lt.u32.totalorder %s577_s30, %s701_s1 }
  0x17   :  { %p583_p10 = pnand %p581_p9, %p578_p8 }
  0x19   :  { %586 = shalt.err (!%p583_p10)
}
  0x1a   :  { %s587_s8 = scalar_lea.vmem %s29_s27, 1024  ;;  %p592_p12 = scmp.lt.s32.totalorder %s29_s27, %s29_s27 }
  0x1b   :  { %p588_p11 = scmp.ne.s32.totalorder %s29_s27, %s587_s8  ;;  %p593_p13 = scmp.lt.s32.totalorder %s587_s8, %s587_s8 }
  0x1d   :  { %p594_p0 = por %p593_p13, %p592_p12 }
  0x1f   :  { %p595_p1 = pnand %p594_p0, %p588_p11 }
  0x21   :  { %598 = shalt.err (!%p595_p1)
}
  0x22   :  { %34 = dma.hbm_to_vmem [thread:$0]  %s701_s1, 1024, %s29_s27, [#allocation6], %s628_s22, %s628_s22, %s629_s23  }
  0x23   :  { %621 = dma.done.wait [#allocation3], 1024  }
  0x24   :  { %622 = vsyncadd [#allocation3], 4294966272 }
  0x25   :  { %623 = dma.done.wait [#allocation6], 1024  }
  0x26   :  { %624 = vsyncadd [#allocation6], 4294966272  ;;  %v539_v0 = vld [vmem:[#allocation5] sm:$0xff]   ;;  %v540_v1 = vld [vmem:[#allocation5 + $0x8] sm:$0xff]  }
  0x27   :  { %486 = vmatprep.subr.bf16.mxu0 %v539_v0  ;;  %518 = vmatprep.subr.bf16.mxu1 %v539_v0  ;;  %v541_v2 = vld [vmem:[#allocation5 + $0x10] sm:$0xff]   ;;  %v542_v3 = vld [vmem:[#allocation5 + $0x18] sm:$0xff]   ;;  %v547_v4 = vld [vmem:[#allocation2] sm:$0xff]  }
  0x28   :  { %487 = vmatpush3.bf16.msra.mxu0 %v539_v0  ;;  %526 = vmatpush3.bf16.msra.mxu1 %v539_v0  ;;  %v548_v5 = vld [vmem:[#allocation2 + $0x20] sm:$0xff]   ;;  %v544_v7 = vld [vmem:[#allocation5 + $0x28] sm:$0xff]   ;;  %v545_v8 = vld [vmem:[#allocation5 + $0x30] sm:$0xff]  }
  0x29   :  { %488 = vmatprep.subr.bf16.mxu0 %v540_v1  ;;  %519 = vmatprep.subr.bf16.mxu1 %v540_v1  ;;  %v543_v6 = vld [vmem:[#allocation5 + $0x20] sm:$0xff]   ;;  %v546_v9 = vld [vmem:[#allocation5 + $0x38] sm:$0xff]   ;;  %v549_v10 = vld [vmem:[#allocation2 + $0x8] sm:$0xff]  }
  0x2a   :  { %502 = vmatprep.mubr.bf16.mxu0 %v547_v4  ;;  %510 = vmatprep.mubr.bf16.mxu1 %v548_v5  ;;  %v550_v11 = vld [vmem:[#allocation2 + $0x28] sm:$0xff]   ;;  %v551_v12 = vld [vmem:[#allocation2 + $0x10] sm:$0xff]   ;;  %v553_v14 = vld [vmem:[#allocation2 + $0x18] sm:$0xff]  }
  0x2b   :  { %v552_v13 = vld [vmem:[#allocation2 + $0x30] sm:$0xff]   ;;  %v554_v15 = vld [vmem:[#allocation2 + $0x38] sm:$0xff]   ;;  %v374_v17 = vld [vmem:[%s702_s2] ss:$0 sm:$0xff]  ;;  %s631_s2 = smov [#allocation7]  }
  0x2c   :  { %489 = vmatpush3.bf16.msra.mxu0 %v540_v1  ;;  %527 = vmatpush3.bf16.msra.mxu1 %v540_v1  ;;  %s361_s11 = sshll.u32 %s631_s2, 4  ;;  %s362_s11 = int_to_ptr.vmem [resolvable:$true] %s361_s11 }
  0x2d   :  { %490 = vmatprep.subr.bf16.mxu0 %v541_v2  ;;  %520 = vmatprep.subr.bf16.mxu1 %v541_v2  ;;  %s599_s12 = scalar_lea.vmem %s362_s11, 1024  ;;  %p604_p3 = scmp.lt.s32.totalorder %s362_s11, %s362_s11 }
  0x2e   :  { %p600_p2 = scmp.ne.s32.totalorder %s362_s11, %s599_s12  ;;  %p605_p4 = scmp.lt.s32.totalorder %s599_s12, %s599_s12 }
  0x30   :  { %491 = vmatpush3.bf16.msra.mxu0 %v541_v2  ;;  %528 = vmatpush3.bf16.msra.mxu1 %v541_v2  ;;  %p606_p5 = por %p605_p4, %p604_p3 }
  0x31   :  { %492 = vmatprep.subr.bf16.mxu0 %v542_v3  ;;  %521 = vmatprep.subr.bf16.mxu1 %v542_v3 }
  0x32   :  { %p607_p6 = pnand %p606_p5, %p600_p2 }
  0x34   :  { %493 = vmatpush3.bf16.msra.mxu0 %v542_v3  ;;  %529 = vmatpush3.bf16.msra.mxu1 %v542_v3 }
  0x35   :  { %494 = vmatprep.subr.bf16.mxu0 %v543_v6  ;;  %522 = vmatprep.subr.bf16.mxu1 %v543_v6 }
  0x38   :  { %495 = vmatpush3.bf16.msra.mxu0 %v543_v6  ;;  %530 = vmatpush3.bf16.msra.mxu1 %v543_v6 }
  0x39   :  { %496 = vmatprep.subr.bf16.mxu0 %v544_v7  ;;  %523 = vmatprep.subr.bf16.mxu1 %v544_v7 }
  0x3c   :  { %497 = vmatpush3.bf16.msra.mxu0 %v544_v7  ;;  %531 = vmatpush3.bf16.msra.mxu1 %v544_v7 }
  0x3d   :  { %498 = vmatprep.subr.bf16.mxu0 %v545_v8  ;;  %524 = vmatprep.subr.bf16.mxu1 %v545_v8 }
  0x40   :  { %499 = vmatpush3.bf16.msra.mxu0 %v545_v8  ;;  %532 = vmatpush3.bf16.msra.mxu1 %v545_v8 }
  0x41   :  { %500 = vmatprep.subr.bf16.mxu0 %v546_v9  ;;  %525 = vmatprep.subr.bf16.mxu1 %v546_v9 }
  0x44   :  { %501 = vmatpush3.bf16.msra.mxu0 %v546_v9  ;;  %533 = vmatpush3.bf16.msra.mxu1 %v546_v9 }
  0x47   :  { %503 = vmatmul.mubr.bf16.vlgmr.msra.gmra.mrb[0].mxu0 %v549_v10  ;;  %511 = vmatmul.mubr.bf16.vlgmr.msra.gmra.mrb[0].mxu1 %v550_v11 }
  0x48   :  { %506 = vmatprep.mubr.bf16.mxu0 %v551_v12  ;;  %514 = vmatprep.mubr.bf16.mxu1 %v552_v13 }
  0x4f   :  { %507 = vmatmul.mubr.bf16.gmra.mrb[4].mxu0 %v553_v14  ;;  %515 = vmatmul.mubr.bf16.gmra.mrb[4].mxu1 %v554_v15 }
 0x11a   :  { %v504_v16 = vpop.f32.mrb[0].mxu0  ;;  %v512_v18 = vpop.f32.mrb[0].mxu1 }
 0x11b   :  { %v213_v19 = vpop.f32.mrb[1].mxu0  ;;  %v245_v20 = vpop.f32.mrb[1].mxu1  ;;  %v222_v23 = vadd.f32 %v504_v16, %v374_v17  ;;  %v254_v24 = vadd.f32 %v512_v18, %v374_v17 }
 0x11c   :  { %v505_v21 = vpop.f32.mrb[2].mxu0  ;;  %v513_v22 = vpop.f32.mrb[2].mxu1  ;;  %v214_v29 = vadd.f32 %v374_v17, %v213_v19  ;;  %v246_v30 = vadd.f32 %v374_v17, %v245_v20 }
 0x11d   :  { %v225_v25 = vadd.f32 %v505_v21, %v374_v17  ;;  %v257_v26 = vadd.f32 %v513_v22, %v374_v17  ;;  %v216_v27 = vpop.f32.mrb[3].mxu0  ;;  %v248_v28 = vpop.f32.mrb[3].mxu1 }
 0x11e   :  { %v217_v31 = vadd.f32 %v374_v17, %v216_v27  ;;  %v249_v32 = vadd.f32 %v374_v17, %v248_v28 }
 0x11f   :  { %v431_v33 = vpack.c.bf16 %v225_v25, %v222_v23  ;;  %v451_v34 = vpack.c.bf16 %v257_v26, %v254_v24 }
 0x120   :  { %v426_v35 = vpack.c.bf16 %v217_v31, %v214_v29  ;;  %v446_v36 = vpack.c.bf16 %v249_v32, %v246_v30 }
 0x121   :  { %463 = vst [vmem:[#allocation7 + $0x8] sm:$0xff] %v431_v33   ;;  %467 = vst [vmem:[#allocation7 + $0x28] sm:$0xff] %v451_v34  }
 0x122   :  { %427 = vst [vmem:[#allocation7] sm:$0xff] %v426_v35   ;;  %466 = vst [vmem:[#allocation7 + $0x20] sm:$0xff] %v446_v36   ;;  %v508_v37 = vpop.f32.mrb[4].mxu0  ;;  %v516_v38 = vpop.f32.mrb[4].mxu1 }
 0x123   :  { %v229_v39 = vpop.f32.mrb[5].mxu0  ;;  %v261_v40 = vpop.f32.mrb[5].mxu1  ;;  %v238_v43 = vadd.f32 %v508_v37, %v374_v17  ;;  %v270_v44 = vadd.f32 %v516_v38, %v374_v17 }
 0x124   :  { %v509_v41 = vpop.f32.mrb[6].mxu0  ;;  %v517_v42 = vpop.f32.mrb[6].mxu1  ;;  %v230_v49 = vadd.f32 %v374_v17, %v229_v39  ;;  %v262_v50 = vadd.f32 %v374_v17, %v261_v40 }
 0x125   :  { %v241_v45 = vadd.f32 %v509_v41, %v374_v17  ;;  %v273_v46 = vadd.f32 %v517_v42, %v374_v17  ;;  %v232_v47 = vpop.f32.mrb[7].mxu0  ;;  %v264_v48 = vpop.f32.mrb[7].mxu1 }
 0x126   :  { %v233_v51 = vadd.f32 %v374_v17, %v232_v47  ;;  %v265_v52 = vadd.f32 %v374_v17, %v264_v48 }
 0x127   :  { %v441_v53 = vpack.c.bf16 %v241_v45, %v238_v43  ;;  %v461_v54 = vpack.c.bf16 %v273_v46, %v270_v44 }
 0x128   :  { %v436_v55 = vpack.c.bf16 %v233_v51, %v230_v49  ;;  %v456_v56 = vpack.c.bf16 %v265_v52, %v262_v50 }
 0x129   :  { %465 = vst [vmem:[#allocation7 + $0x18] sm:$0xff] %v441_v53   ;;  %469 = vst [vmem:[#allocation7 + $0x38] sm:$0xff] %v461_v54  }
 0x12a   :  { %464 = vst [vmem:[#allocation7 + $0x10] sm:$0xff] %v436_v55   ;;  %468 = vst [vmem:[#allocation7 + $0x30] sm:$0xff] %v456_v56  }
 0x12b   :  { %610 = shalt.err (!%p607_p6)
}
 0x12c   :  { %s611_s15 = scalar_lea.hbm %s703_s3, 1024 }
 0x12d   :  { %p612_p7 = scmp.ne.s32.totalorder %s703_s3, %s611_s15  ;;  %p615_p8 = scmp.lt.u32.totalorder %s611_s15, %s703_s3 }
 0x12f   :  { %p617_p9 = pnand %p615_p8, %p612_p7 }
 0x131   :  { %620 = shalt.err (!%p617_p9)
}
 0x132   :  { %367 = dma.vmem_to_hbm [thread:$0]  %s362_s11, 1024, %s703_s3, [#allocation4], %s628_s22, %s628_s22, %s629_s23  }
 0x133   :  { %625 = dma.done.wait [#allocation4], 1024  }
 0x134   :  { %626 = vsyncadd [#allocation4], 4294966272 }
 0x135   :  { %371 = vsyncpa [#allocation3], 1 }
 0x136   :  { %372 = vsyncpa [#allocation6], 1 }
 0x137   :  { %373 = vsyncpa [#allocation4], 1 }

</bundles_post_ra>
